<compile_context>
chip_gen: v6e
topology: v6e:2x2x1
jax: 0.10.0
libtpu: 0.0.40
codegen_flags: <defaults>
</compile_context>

<pallas_src>
import numpy as np
import jax
import jax.numpy as jnp
from jax.experimental import pallas as pl
from jax.experimental.pallas import tpu as pltpu


def _round_up(x, m):
    return ((x + m - 1) // m) * m


# ----------------------------- Pallas kernel --------------------------------

def _mixdeq_kernel(x_ref, w_ref, o_ref):
    # x_ref: (tm, K) bits, w_ref: (K, N) block-diagonal powers of two,
    # o_ref: (tm, N).  One MXU matmul with f32 accumulation, cast on store.
    w = w_ref[...]
    x = x_ref[...].astype(w.dtype)              # exact for {0,1} bit inputs
    acc = jnp.dot(x, w, preferred_element_type=jnp.float32)
    o_ref[...] = acc.astype(o_ref.dtype)


def _vmem_capacity_bytes():
    try:
        return int(pltpu.get_tpu_info().vmem_capacity_bytes)
    except Exception:
        return 64 * 1024 * 1024                 # conservative (v7x per-TC VMEM)


def _tile_bytes(tm, K, N, x_itemsize, w_itemsize, o_itemsize):
    # Conservative VMEM footprint: last dim padded to 128 lanes, x/out tiles
    # double-buffered, weight counted twice even if single-buffered.
    Kl = _round_up(K, 128)
    Nl = _round_up(N, 128)
    w_b = _round_up(K, 8) * Nl * w_itemsize
    return 2 * (w_b + tm * Kl * x_itemsize + tm * Nl * o_itemsize)


def mixdeq_matmul(x, w, *, block_m=4096, out_dtype=jnp.bfloat16):
    """Fused MixDequantization forward: a single pallas_call computing x @ w."""
    M, K = x.shape
    Kw, N = w.shape
    assert K == Kw

    capacity = _vmem_capacity_bytes()
    budget = (capacity * 3) // 4                # headroom for compiler scratch
    o_itemsize = jnp.dtype(out_dtype).itemsize

    # Batch tile: as large as the budget allows (amortizes per-step overhead),
    # but capped so big batches keep ~8 grid steps (pipelining + v7x 2 TCs),
    # with a 512-row floor so the fixed overhead stays amortized.
    tm = min(block_m, _round_up(M, 8))
    step_cap = max(512, _round_up(pl.cdiv(M, 8), 8))
    tm = min(tm, step_cap)
    while tm > 8 and _tile_bytes(tm, K, N, x.dtype.itemsize,
                                 w.dtype.itemsize, o_itemsize) > budget:
        tm = max(8, _round_up(tm // 2, 8))
    tm = max(8, _round_up(tm, 8))

    grid = (pl.cdiv(M, tm),)                    # ragged last block is masked

    # Weight is resident across the grid (constant index_map); single-buffer
    # it when this jax version exposes pipeline_mode (saves a dead VMEM copy).
    try:
        w_spec = pl.BlockSpec((K, N), lambda i: (0, 0),
                              pipeline_mode=pl.Buffered(1))
    except TypeError:
        w_spec = pl.BlockSpec((K, N), lambda i: (0, 0))

    need = _tile_bytes(tm, K, N, x.dtype.itemsize, w.dtype.itemsize, o_itemsize)
    vmem_limit = int(min(budget, max(need + 8 * 1024 * 1024, 32 * 1024 * 1024)))

    return pl.pallas_call(
        _mixdeq_kernel,
        out_shape=jax.ShapeDtypeStruct((M, N), out_dtype),
        grid_spec=pltpu.PrefetchScalarGridSpec(
            num_scalar_prefetch=0,
            grid=grid,
            in_specs=[
                pl.BlockSpec((tm, K), lambda i: (i, 0)),  # batch tile of bits
                w_spec,                                   # resident weight
            ],
            out_specs=pl.BlockSpec((tm, N), lambda i: (i, 0)),
        ),
        compiler_params=pltpu.CompilerParams(
            dimension_semantics=("parallel",),  # batch tiles are independent
            vmem_limit_bytes=vmem_limit,
        ),
    )(x, w)


# ------------------------------ module port ---------------------------------

def _build_mixdeq_weight(dim1, dim2, n_q_bit, dtype):
    """Block-diagonal dequant weight, shape (dim1*(B-1) + dim2*B, dim1+dim2)."""
    b1, b2 = n_q_bit - 1, n_q_bit
    k = dim1 * b1 + dim2 * b2
    w = np.zeros((k, dim1 + dim2), dtype=np.float32)
    for c in range(dim1):                       # first part: (B-1)-bit words
        for i in range(b1):
            w[c * b1 + i, c] = 2.0 ** (b1 - 1 - i)
    off = dim1 * b1
    for c in range(dim2):                       # second part: B-bit words
        for i in range(b2):
            w[off + c * b2 + i, dim1 + c] = 2.0 ** (b2 - 1 - i)
    return jnp.asarray(w, dtype=dtype)          # powers of two: exact in bf16


class MixDequantizationLayer:
    """JAX/Pallas port of the PyTorch MixDequantizationLayer (forward only)."""

    def __init__(self, cfg, dim, compute_dtype=jnp.bfloat16):
        # compute_dtype=bfloat16 is exact for {0,1} bit inputs (weights are
        # powers of two, accumulation is f32).  Use jnp.float32 for arbitrary
        # real-valued "soft bit" inputs.
        self.cfg = cfg
        self.dim1 = round(dim * cfg.mixq_factor)
        assert self.dim1 > 0
        self.dim2 = dim - self.dim1
        self.b1 = cfg.n_q_bit - 1
        self.b2 = cfg.n_q_bit
        self.out_dim = self.dim1 + self.dim2
        self.in_dim = self.dim1 * self.b1 + self.dim2 * self.b2
        # bf16 output is exact iff integer outputs fit in 8 bits (<= 255).
        self.out_dtype = jnp.bfloat16 if cfg.n_q_bit <= 8 else jnp.float32
        # Built once at construction: no per-call weight materialization.
        self.w = _build_mixdeq_weight(self.dim1, self.dim2, cfg.n_q_bit,
                                      compute_dtype)

    def __call__(self, x):
        # Bit2Num keys off x.shape[1], so the module is effectively 2-D.
        assert x.ndim == 2 and x.shape[1] == self.in_dim
        return mixdeq_matmul(x, self.w, out_dtype=self.out_dtype)


# ----------------------------- pure-JAX reference ---------------------------

def _bit2num_ref(bits, B):
    b = bits.astype(jnp.float32).reshape(bits.shape[0], -1, B)
    wts = 2.0 ** jnp.arange(B - 1, -1, -1, dtype=jnp.float32)
    return jnp.sum(b * wts, axis=-1)


def reference_forward(x, dim1, n_q_bit):
    b1 = n_q_bit - 1
    x1 = x[:, : dim1 * b1]
    x2 = x[:, dim1 * b1:]
    return jnp.concatenate(
        [_bit2num_ref(x1, b1), _bit2num_ref(x2, n_q_bit)], axis=-1)


if __name__ == "__main__":
    class _Cfg:
        mixq_factor = 0.5
        n_q_bit = 4

    cfg = _Cfg()
    dim = 32       # dequantized width -> dim1=16 (3-bit words), dim2=16 (4-bit)
    batch = 8

    layer = MixDequantizationLayer(cfg, dim)

    key = jax.random.PRNGKey(0)
    # bf16 bit stream: halves the dominant input HBM read; exact for {0,1}.
    bits = jax.random.bernoulli(
        key, 0.5, (batch, layer.in_dim)).astype(jnp.bfloat16)   # (8, 112)

    out = jax.block_until_ready(layer(bits))

    ref = reference_forward(bits, layer.dim1, cfg.n_q_bit)
    assert out.shape == (batch, dim)
    assert jnp.allclose(out.astype(jnp.float32), ref, atol=1e-6, rtol=0), \
        "mismatch vs reference"

    print("KERNEL_OK")
</pallas_src>

<mosaic_0001>
module attributes {stable_mosaic.version = 11 : i64} {
  func.func @_mixdeq_kernel(%arg0: i32, %arg1: memref<8x112xbf16, #tpu.memory_space<vmem>>, %arg2: memref<112x32xbf16, #tpu.memory_space<vmem>>, %arg3: memref<8x32xbf16, #tpu.memory_space<vmem>>) attributes {dimension_semantics = [#tpu.dimension_semantics<parallel>], iteration_bounds = array<i64: 1>, scalar_prefetch = 0 : i64, scratch_operands = 0 : i64, tpu.core_type = #tpu.core_type<tc>, window_params = [{transform_indices = @transform_0, window_bounds = array<i64: 8, 112>}, {pipeline_mode = #tpu.pipeline_mode<synchronous>, transform_indices = @transform_1, window_bounds = array<i64: 112, 32>}, {transform_indices = @transform_2, window_bounds = array<i64: 8, 32>}]} {
    %c0 = arith.constant 0 : index
    %c0_0 = arith.constant 0 : index
    %0 = vector.load %arg2[%c0, %c0_0] : memref<112x32xbf16, #tpu.memory_space<vmem>>, vector<112x32xbf16>
    %c0_1 = arith.constant 0 : index
    %c0_2 = arith.constant 0 : index
    %1 = vector.load %arg1[%c0_1, %c0_2] : memref<8x112xbf16, #tpu.memory_space<vmem>>, vector<8x112xbf16>
    %cst = arith.constant dense<0.000000e+00> : vector<8x32xf32>
    %2 = tpu.matmul %1, %0, %cst {dimension_numbers = #tpu.dot_dimension_numbers<[1], [0], [0], [1], [0, 0, 1, 1], [], []>} : vector<8x112xbf16>, vector<112x32xbf16>, vector<8x32xf32> -> vector<8x32xf32>
    %3 = arith.truncf %2 : vector<8x32xf32> to vector<8x32xbf16>
    %c0_3 = arith.constant 0 : index
    %c0_4 = arith.constant 0 : index
    %4 = vector.load %arg3[%c0_3, %c0_4] : memref<8x32xbf16, #tpu.memory_space<vmem>>, vector<8x32xbf16>
    tpu.vector_store %arg3[%c0_3, %c0_4], %3 {strides = array<i32>} : memref<8x32xbf16, #tpu.memory_space<vmem>>, vector<8x32xbf16>,
    return
  }
  func.func @transform_0(%arg0: i32) -> (i32, i32) {
    %c0_i32 = arith.constant 0 : i32
    %c0_i32_0 = arith.constant 0 : i32
    return %arg0, %c0_i32 : i32, i32
  }
  func.func @transform_1(%arg0: i32) -> (i32, i32) {
    %c0_i32 = arith.constant 0 : i32
    %c0_i32_0 = arith.constant 0 : i32
    %c0_i32_1 = arith.constant 0 : i32
    return %c0_i32, %c0_i32_0 : i32, i32
  }
  func.func @transform_2(%arg0: i32) -> (i32, i32) {
    %c0_i32 = arith.constant 0 : i32
    %c0_i32_0 = arith.constant 0 : i32
    return %arg0, %c0_i32 : i32, i32
  }
}

</mosaic_0001>

<bundles_post_ra>
// kernel: tpu_custom_call.1
= control target key start
LH: loop header
LB: loop body
LE: loop exit
PB: predicated region body
PF: predicated region fallthrough
CT: control target
= control target key end

     0   :  { %v197_v1 = vmov 0.0   ;;  %vm198_vm0 = vmmov 0   ;;  %s242_s0 = inlined_call_operand.vmem [shape: bf16[8,112], index: 0, kind: input, shape index: {}]   ;;  %s243_s1 = inlined_call_operand.vmem [shape: bf16[112,32], index: 1, kind: input, shape index: {}]   ;;  %s244_s2 = inlined_call_operand.hbm [shape: bf16[8,32], index: 2, kind: output, shape index: {}]  }
   0x1   :  { %v168_v0 = vld [vmem:[%s243_s1 + $0x30] sm:$0xff]   ;;  %147 = vmatprep.subr.bf16.mxu0 %v197_v1  ;;  %v169_v2 = vld [vmem:[%s243_s1 + $0x28] sm:$0xff]   ;;  %161 = vmatprep.mubr.msk.bf16.mxu0 %vm198_vm0, %v197_v1  ;;  %v170_v3 = vld [vmem:[%s243_s1 + $0x20] sm:$0xff]  }
   0x2   :  { %148 = vmatpush3.bf16.msra.mxu0 %v168_v0 }
   0x3   :  { %149 = vmatprep.subr.bf16.mxu0 %v197_v1 }
   0x6   :  { %150 = vmatpush3.bf16.msra.mxu0 %v169_v2 }
   0x7   :  { %151 = vmatprep.subr.bf16.mxu0 %v197_v1 }
   0x8   :  { %7 = vsyncpa [#allocation3], 0  ;;  %v171_v4 = vld [vmem:[%s243_s1 + $0x18] sm:$0xff]   ;;  %v172_v5 = vld [vmem:[%s243_s1 + $0x10] sm:$0xff]   ;;  %vm70_vm1 = vcmask 916480   ;;  %s199_s25 = smov [#allocation2]  }
   0x9   :  { %v173_v6 = vld [vmem:[%s243_s1 + $0x8] sm:$0xff]   ;;  %v174_v7 = vld [vmem:[%s243_s1] sm:$0xff]   ;;  %s123_s26 = sshll.u32 %s199_s25, 4  ;;  %vm115_vm2 = vcmask 257024   ;;  %s124_s26 = int_to_ptr.vmem [resolvable:$true] %s123_s26 }
   0xa   :  { %152 = vmatpush3.bf16.msra.mxu0 %v170_v3  ;;  %v27_v8 = vld [vmem:[%s242_s0] sm:$0xf]  ;;  %s175_s27 = scalar_lea.vmem %s124_s26, 64  ;;  %p180_p1 = scmp.lt.s32.totalorder %s124_s26, %s124_s26 }
   0xb   :  { %153 = vmatprep.subr.bf16.mxu0 %v197_v1  ;;  %p176_p0 = scmp.ne.s32.totalorder %s124_s26, %s175_s27  ;;  %p181_p2 = scmp.lt.s32.totalorder %s175_s27, %s175_s27 }
   0xd   :  { %p182_p3 = por %p181_p2, %p180_p1 }
   0xe   :  { %154 = vmatpush3.bf16.msra.mxu0 %v171_v4 }
   0xf   :  { %155 = vmatprep.subr.bf16.mxu0 %v197_v1  ;;  %p183_p4 = pnand %p182_p3, %p176_p0 }
  0x12   :  { %156 = vmatpush3.bf16.msra.mxu0 %v172_v5 }
  0x13   :  { %157 = vmatprep.subr.bf16.mxu0 %v197_v1 }
  0x16   :  { %158 = vmatpush3.bf16.msra.mxu0 %v173_v6 }
  0x17   :  { %159 = vmatprep.subr.bf16.mxu0 %v197_v1 }
  0x1a   :  { %160 = vmatpush3.bf16.msra.mxu0 %v174_v7 }
  0x1d   :  { %162 = vmatmul.mubr.msk.bf16.vlgmr.msra.gmra.mxu0 %vm70_vm1, %v27_v8 }
  0xdd   :  { %v108_v9 = vpop.f32.mrf.mxu0 }
  0xde   :  { %v114_v10 = vpack.c.bf16 %v108_v9, %v108_v9 }
  0xdf   :  { %v163_v11 = vpop.f32.mrf.mxu0 }
  0xe0   :  { %116 = vst.msk [vmem:[#allocation2] sm:$0xf] %vm115_vm2, %v114_v10 }
  0xe1   :  { %v111_v12 = vpop.f32.mrf.mxu0 }
  0xe2   :  { %186 = shalt.err (!%p183_p4)
}
  0xe3   :  { %126 = dma.vmem_to_hbm [thread:$0]  %s124_s26, 64, %s244_s2, [#allocation3]   ;;  %v164_v13 = vpop.f32.mrf.mxu0 }
  0xe4   :  { %195 = dma.done.wait [#allocation3], 64  }
  0xe5   :  { %196 = vsyncadd [#allocation3], 4294967232 }
  0xe6   :  { %130 = vsyncpa [#allocation3], 1 }

</bundles_post_ra>
